<compile_context>
chip_gen: v5e
topology: v5e:2x2
jax: 0.10.0
libtpu: 0.0.40
codegen_flags: <defaults>
</compile_context>

<pallas_src>
import functools
import math

import jax
import jax.numpy as jnp
from jax.experimental import pallas as pl
from jax.experimental.pallas import tpu as pltpu

_GELU_C = math.sqrt(2.0 / math.pi)
_MIB = 1024 * 1024


def _round_up(n, m):
    return ((n + m - 1) // m) * m


def _cdiv(a, b):
    return -(-a // b)


def _chip_generation():
    """Best-effort TPU generation (0 if unknown)."""
    try:
        kind = jax.devices()[0].device_kind.lower()
    except Exception:
        return 0
    for g in (7, 6, 5, 4):
        if "v%d" % g in kind:
            return g
    return 0


def _vmem_capacity_bytes():
    """Physical VMEM per core; conservative fallback when undetectable."""
    try:
        cap = int(pltpu.get_tpu_info().vmem_capacity_bytes)
        if cap > 0:
            return cap
    except Exception:
        pass
    gen = _chip_generation()
    if gen in (5, 6):
        return 128 * _MIB
    return 64 * _MIB  # v7x and conservative default for unknown parts


def _mlp_kernel(x_ref, wfc_ref, bfc_ref, wproj_ref, bproj_ref, o_ref, acc_ref,
                *, n_hblocks, act_dtype):
    # x_ref:     (tm, C)   token tile (constant across the hidden axis)
    # wfc_ref:   (C, th)   hidden-block slice of W_fc
    # bfc_ref:   (1, th)   hidden-block slice of b_fc
    # wproj_ref: (th, C)   hidden-block slice of W_proj
    # bproj_ref: (1, C)    full b_proj
    # o_ref:     (tm, C)   output tile (written only on the last hidden block)
    # acc_ref:   (tm, C)   fp32 VMEM accumulator (scratch; unused if n_hblocks==1)
    hb = pl.program_id(1)

    # c_fc block: (tm, C) @ (C, th) -> (tm, th), fp32 accumulation on the MXU.
    h = jnp.dot(x_ref[...], wfc_ref[...], preferred_element_type=jnp.float32)
    h = (h + bfc_ref[...].astype(jnp.float32)).astype(act_dtype)

    # GELU(approximate='tanh').  tanh runs on the EUP slot; on v6e/v7x with
    # bf16 inputs the whole chain runs in bf16 (half the VPU/EUP work).
    g = 0.5 * h * (1.0 + jnp.tanh(_GELU_C * h * (1.0 + 0.044715 * (h * h))))

    # c_proj partial: (tm, th) @ (th, C), fp32 accumulation on the MXU.
    partial = jnp.dot(g.astype(wproj_ref.dtype), wproj_ref[...],
                      preferred_element_type=jnp.float32)

    if n_hblocks == 1:
        # Single hidden block: write output directly, accumulator untouched.
        o_ref[...] = (partial
                      + bproj_ref[...].astype(jnp.float32)).astype(o_ref.dtype)
    else:
        @pl.when(hb == 0)
        def _():
            # First block: plain store — no zero-init + add round-trip.
            acc_ref[...] = partial

        @pl.when(jnp.logical_and(hb > 0, hb < n_hblocks - 1))
        def _():
            acc_ref[...] += partial

        @pl.when(hb == n_hblocks - 1)
        def _():
            # Last block: fuse final accumulate + bias + cast into the store.
            o_ref[...] = (acc_ref[...] + partial
                          + bproj_ref[...].astype(jnp.float32)).astype(o_ref.dtype)


def mlp_pallas(x, w_fc, b_fc, w_proj, b_proj, *, tm=1024, th=1024,
               act_dtype=None, interpret=False):
    """nanoGPT MLP forward.

    x: (B, T, C).  w_fc: (C, 4C), b_fc: (4C,), w_proj: (4C, C), b_proj: (C,)
    (PyTorch Linear weights transposed, i.e. stored (in_features, out_features)).
    For the bf16 MXU fast path on v6e/v7x, pass bf16 x / weights.
    """
    B, T, C = x.shape
    H = w_fc.shape[1]
    M = B * T

    x_isz = jnp.dtype(x.dtype).itemsize
    w_isz = jnp.dtype(w_fc.dtype).itemsize
    gen = _chip_generation()

    if act_dtype is None:
        # bf16 VPU/EUP exists on v6e/v7x; keep activation math in f32 otherwise.
        act_dtype = x.dtype if (x.dtype == jnp.bfloat16 and gen >= 6) else jnp.float32

    # Sublane packing of the token axis depends on the input dtype.
    sub = max(8, 32 // x_isz)              # f32: 8, bf16: 16, int8/fp8: 32
    C_pad = _round_up(C, 128)

    tm_eff = min(_round_up(tm, sub), _round_up(M, sub))
    th_eff = min(_round_up(th, 128), _round_up(H, 128))

    # ---- VMEM-capacity-aware tile sizing -----------------------------------
    cap = _vmem_capacity_bytes()
    budget = int(0.80 * cap)               # leave headroom for compiler scratch

    def footprint(tm_, th_):
        weights = 2 * (C_pad * th_ + th_ * C_pad) * w_isz   # W_fc + W_proj (double-buffered)
        biases = 2 * 8 * (th_ + C_pad) * w_isz              # (1,*) blocks pad to 8 sublanes
        io = 2 * 2 * tm_ * C_pad * x_isz                    # x tile + out tile (double-buffered)
        acc = tm_ * C_pad * 4                               # fp32 accumulator scratch
        interm = 2 * tm_ * th_ * 4                          # h / g intermediates (f32 worst case)
        return weights + biases + io + acc + interm

    min_tm = min(tm_eff, max(sub, 256))
    while footprint(tm_eff, th_eff) > budget:
        if th_eff > 256:
            th_eff = _round_up(th_eff // 2, 128)            # shrink hidden block first (v7x-safe)
        elif tm_eff > min_tm:
            tm_eff = _round_up(tm_eff // 2, sub)            # then the token tile
        elif th_eff > 128:
            th_eff = 128
        else:
            break                                           # tiny shapes always fit anyway

    # Prefer an even number of token tiles (>=2) so the "parallel" token axis
    # load-balances across both TensorCores on megacore parts (v7x).
    n_tiles = _cdiv(M, tm_eff)
    if n_tiles > 1 and n_tiles % 2 == 1:
        align = 256 if tm_eff >= 256 else sub
        cand = _round_up(_cdiv(M, n_tiles + 1), align)
        if 0 < cand < tm_eff:
            tm_eff = cand

    M_pad = _round_up(M, tm_eff)
    H_pad = _round_up(H, th_eff)

    need = footprint(tm_eff, th_eff)
    vmem_limit = int(min(int(need * 1.3) + 4 * _MIB, int(0.85 * cap)))
    vmem_limit = max(vmem_limit, int(need) + 2 * _MIB, 32 * _MIB)
    vmem_limit = int(min(vmem_limit, cap))

    # ---- Padding (only when actually misaligned; exact by zero-padding) ----
    x2 = x.reshape(M, C)
    if (M_pad, C_pad) != (M, C):
        x2 = jnp.pad(x2, ((0, M_pad - M), (0, C_pad - C)))
    wfc = w_fc if (C_pad, H_pad) == (C, H) else jnp.pad(w_fc, ((0, C_pad - C), (0, H_pad - H)))
    bfc = (b_fc if H_pad == H else jnp.pad(b_fc, (0, H_pad - H))).reshape(1, H_pad)
    wproj = w_proj if (H_pad, C_pad) == (H, C) else jnp.pad(w_proj, ((0, H_pad - H), (0, C_pad - C)))
    bproj = (b_proj if C_pad == C else jnp.pad(b_proj, (0, C_pad - C))).reshape(1, C_pad)

    grid = (M_pad // tm_eff, H_pad // th_eff)
    grid_m, grid_h = grid

    w_bytes = (wfc.size + wproj.size + bfc.size + bproj.size) * w_isz
    cost = pl.CostEstimate(
        flops=int(4 * M_pad * C_pad * H_pad),                   # two matmuls, 2*M*K*N each
        transcendentals=int(M_pad * H_pad),                     # one tanh per hidden element
        # x read + out write + weights re-streamed once per token tile.
        bytes_accessed=int(2 * M_pad * C_pad * x_isz + grid_m * w_bytes),
    )

    kernel = functools.partial(_mlp_kernel, n_hblocks=grid_h, act_dtype=act_dtype)

    out = pl.pallas_call(
        kernel,
        out_shape=jax.ShapeDtypeStruct((M_pad, C_pad), x.dtype),
        grid=grid,
        in_specs=[
            pl.BlockSpec((tm_eff, C_pad), lambda i, h: (i, 0)),   # x tile
            pl.BlockSpec((C_pad, th_eff), lambda i, h: (0, h)),   # W_fc block
            pl.BlockSpec((1, th_eff), lambda i, h: (0, h)),       # b_fc block
            pl.BlockSpec((th_eff, C_pad), lambda i, h: (h, 0)),   # W_proj block
            pl.BlockSpec((1, C_pad), lambda i, h: (0, 0)),        # b_proj
        ],
        out_specs=pl.BlockSpec((tm_eff, C_pad), lambda i, h: (i, 0)),
        scratch_shapes=[pltpu.VMEM((tm_eff, C_pad), jnp.float32)],
        compiler_params=pltpu.CompilerParams(
            dimension_semantics=("parallel", "arbitrary"),
            vmem_limit_bytes=vmem_limit),
        cost_estimate=cost,
        interpret=interpret,
    )(x2, wfc, bfc, wproj, bproj)

    if (M_pad, C_pad) != (M, C):
        out = out[:M, :C]
    return out.reshape(B, T, C)


def mlp_reference(x, w_fc, b_fc, w_proj, b_proj):
    h = jnp.dot(x, w_fc) + b_fc
    g = 0.5 * h * (1.0 + jnp.tanh(_GELU_C * (h + 0.044715 * h ** 3)))
    return jnp.dot(g, w_proj) + b_proj


if __name__ == "__main__":
    # Small GPT-like config: batch=2, seq=8, n_embd=32 -> hidden=128.
    B, T, C = 2, 8, 32
    H = 4 * C

    key = jax.random.PRNGKey(0)
    kx, k1, k2, k3, k4 = jax.random.split(key, 5)

    x = jax.random.normal(kx, (B, T, C), dtype=jnp.float32)
    w_fc = jax.random.normal(k1, (C, H), dtype=jnp.float32) * 0.02
    b_fc = jax.random.normal(k2, (H,), dtype=jnp.float32) * 0.02
    w_proj = jax.random.normal(k3, (H, C), dtype=jnp.float32) * 0.02
    b_proj = jax.random.normal(k4, (C,), dtype=jnp.float32) * 0.02

    # fp32 path.
    y = jax.block_until_ready(mlp_pallas(x, w_fc, b_fc, w_proj, b_proj))
    y_ref = mlp_reference(x, w_fc, b_fc, w_proj, b_proj)
    assert y.shape == (B, T, C)
    assert jnp.allclose(y, y_ref, atol=1e-5, rtol=1e-5), "fp32 mismatch vs reference"

    # bf16 fast path (bf16 MXU, bf16 GELU on v6e/v7x); loose tolerance.
    xb = x.astype(jnp.bfloat16)
    wfc_b, bfc_b = w_fc.astype(jnp.bfloat16), b_fc.astype(jnp.bfloat16)
    wpj_b, bpj_b = w_proj.astype(jnp.bfloat16), b_proj.astype(jnp.bfloat16)
    yb = jax.block_until_ready(mlp_pallas(xb, wfc_b, bfc_b, wpj_b, bpj_b))
    yb_ref = mlp_reference(xb.astype(jnp.float32), wfc_b.astype(jnp.float32),
                           bfc_b.astype(jnp.float32), wpj_b.astype(jnp.float32),
                           bpj_b.astype(jnp.float32))
    assert yb.shape == (B, T, C)
    assert jnp.allclose(yb.astype(jnp.float32), yb_ref, atol=2e-2, rtol=5e-2), \
        "bf16 mismatch vs reference"

    print("KERNEL_OK")
</pallas_src>

<mosaic_0001>
module attributes {stable_mosaic.version = 11 : i64} {
  func.func @_mlp_kernel(%arg0: i32, %arg1: i32, %arg2: memref<16x128xf32, #tpu.memory_space<vmem>>, %arg3: memref<128x128xf32, #tpu.memory_space<vmem>>, %arg4: memref<1x128xf32, #tpu.memory_space<vmem>>, %arg5: memref<128x128xf32, #tpu.memory_space<vmem>>, %arg6: memref<1x128xf32, #tpu.memory_space<vmem>>, %arg7: memref<16x128xf32, #tpu.memory_space<vmem>>, %arg8: memref<16x128xf32, #tpu.memory_space<vmem>>) attributes {dimension_semantics = [#tpu.dimension_semantics<parallel>, #tpu.dimension_semantics<arbitrary>], iteration_bounds = array<i64: 1, 1>, scalar_prefetch = 0 : i64, scratch_operands = 1 : i64, tpu.core_type = #tpu.core_type<tc>, window_params = [{transform_indices = @transform_0, window_bounds = array<i64: 16, 128>}, {transform_indices = @transform_1, window_bounds = array<i64: 128, 128>}, {transform_indices = @transform_2, window_bounds = array<i64: 1, 128>}, {transform_indices = @transform_3, window_bounds = array<i64: 128, 128>}, {pipeline_mode = #tpu.pipeline_mode<synchronous>, transform_indices = @transform_4, window_bounds = array<i64: 1, 128>}, {transform_indices = @transform_5, window_bounds = array<i64: 16, 128>}]} {
    %c0 = arith.constant 0 : index
    %c0_0 = arith.constant 0 : index
    %0 = vector.load %arg2[%c0, %c0_0] : memref<16x128xf32, #tpu.memory_space<vmem>>, vector<16x128xf32>
    %c0_1 = arith.constant 0 : index
    %c0_2 = arith.constant 0 : index
    %1 = vector.load %arg3[%c0_1, %c0_2] : memref<128x128xf32, #tpu.memory_space<vmem>>, vector<128x128xf32>
    %cst = arith.constant dense<0.000000e+00> : vector<16x128xf32>
    %2 = tpu.matmul %0, %1, %cst {dimension_numbers = #tpu.dot_dimension_numbers<[1], [0], [0], [1], [0, 0, 1, 1], [], []>} : vector<16x128xf32>, vector<128x128xf32>, vector<16x128xf32> -> vector<16x128xf32>
    %c0_3 = arith.constant 0 : index
    %c0_4 = arith.constant 0 : index
    %3 = vector.load %arg4[%c0_3, %c0_4] : memref<1x128xf32, #tpu.memory_space<vmem>>, vector<1x128xf32>
    %4 = vector.broadcast %3 : vector<1x128xf32> to vector<16x128xf32>
    %5 = arith.addf %2, %4 : vector<16x128xf32>
    %cst_5 = arith.constant 5.000000e-01 : f32
    %6 = vector.broadcast %cst_5 : f32 to vector<16x128xf32>
    %7 = arith.mulf %6, %5 : vector<16x128xf32>
    %cst_6 = arith.constant 0.797884583 : f32
    %8 = vector.broadcast %cst_6 : f32 to vector<16x128xf32>
    %9 = arith.mulf %8, %5 : vector<16x128xf32>
    %10 = arith.mulf %5, %5 : vector<16x128xf32>
    %cst_7 = arith.constant 4.471500e-02 : f32
    %11 = vector.broadcast %cst_7 : f32 to vector<16x128xf32>
    %12 = arith.mulf %11, %10 : vector<16x128xf32>
    %cst_8 = arith.constant 1.000000e+00 : f32
    %13 = vector.broadcast %cst_8 : f32 to vector<16x128xf32>
    %14 = arith.addf %13, %12 : vector<16x128xf32>
    %15 = arith.mulf %9, %14 : vector<16x128xf32>
    %16 = math.tanh %15 : vector<16x128xf32>
    %cst_9 = arith.constant 1.000000e+00 : f32
    %17 = vector.broadcast %cst_9 : f32 to vector<16x128xf32>
    %18 = arith.addf %17, %16 : vector<16x128xf32>
    %19 = arith.mulf %7, %18 : vector<16x128xf32>
    %c0_10 = arith.constant 0 : index
    %c0_11 = arith.constant 0 : index
    %20 = vector.load %arg5[%c0_10, %c0_11] : memref<128x128xf32, #tpu.memory_space<vmem>>, vector<128x128xf32>
    %cst_12 = arith.constant dense<0.000000e+00> : vector<16x128xf32>
    %21 = tpu.matmul %19, %20, %cst_12 {dimension_numbers = #tpu.dot_dimension_numbers<[1], [0], [0], [1], [0, 0, 1, 1], [], []>} : vector<16x128xf32>, vector<128x128xf32>, vector<16x128xf32> -> vector<16x128xf32>
    %c0_13 = arith.constant 0 : index
    %c0_14 = arith.constant 0 : index
    %22 = vector.load %arg6[%c0_13, %c0_14] : memref<1x128xf32, #tpu.memory_space<vmem>>, vector<1x128xf32>
    %23 = vector.broadcast %22 : vector<1x128xf32> to vector<16x128xf32>
    %24 = arith.addf %21, %23 : vector<16x128xf32>
    %c0_15 = arith.constant 0 : index
    %c0_16 = arith.constant 0 : index
    %25 = vector.load %arg7[%c0_15, %c0_16] : memref<16x128xf32, #tpu.memory_space<vmem>>, vector<16x128xf32>
    tpu.vector_store %arg7[%c0_15, %c0_16], %24 {strides = array<i32>} : memref<16x128xf32, #tpu.memory_space<vmem>>, vector<16x128xf32>,
    return
  }
  func.func @transform_0(%arg0: i32, %arg1: i32) -> (i32, i32) {
    %c0_i32 = arith.constant 0 : i32
    %c0_i32_0 = arith.constant 0 : i32
    return %arg0, %c0_i32 : i32, i32
  }
  func.func @transform_1(%arg0: i32, %arg1: i32) -> (i32, i32) {
    %c0_i32 = arith.constant 0 : i32
    %c0_i32_0 = arith.constant 0 : i32
    return %c0_i32, %arg1 : i32, i32
  }
  func.func @transform_2(%arg0: i32, %arg1: i32) -> (i32, i32) {
    %c0_i32 = arith.constant 0 : i32
    %c0_i32_0 = arith.constant 0 : i32
    return %c0_i32, %arg1 : i32, i32
  }
  func.func @transform_3(%arg0: i32, %arg1: i32) -> (i32, i32) {
    %c0_i32 = arith.constant 0 : i32
    %c0_i32_0 = arith.constant 0 : i32
    return %arg1, %c0_i32 : i32, i32
  }
  func.func @transform_4(%arg0: i32, %arg1: i32) -> (i32, i32) {
    %c0_i32 = arith.constant 0 : i32
    %c0_i32_0 = arith.constant 0 : i32
    %c0_i32_1 = arith.constant 0 : i32
    return %c0_i32, %c0_i32_0 : i32, i32
  }
  func.func @transform_5(%arg0: i32, %arg1: i32) -> (i32, i32) {
    %c0_i32 = arith.constant 0 : i32
    %c0_i32_0 = arith.constant 0 : i32
    return %arg0, %c0_i32 : i32, i32
  }
}

</mosaic_0001>

<bundles_post_ra>
// kernel: tpu_custom_call.1
= control target key start
LH: loop header
LB: loop body
LE: loop exit
PB: predicated region body
PF: predicated region fallthrough
CT: control target
= control target key end

     0   :  { %10 = vsyncpa [#allocation4], 0  ;;  %s408_s0 = inlined_call_operand.hbm [shape: f32[16,128], index: 0, kind: input, shape index: {}]   ;;  %s409_s1 = inlined_call_operand.hbm [shape: f32[128,128], index: 1, kind: input, shape index: {}]   ;;  %s410_s2 = inlined_call_operand.vmem [shape: f32[1,128], index: 2, kind: input, shape index: {}]   ;;  %s411_s3 = inlined_call_operand.hbm [shape: f32[128,128], index: 3, kind: input, shape index: {}]   ;;  %s412_s4 = inlined_call_operand.vmem [shape: f32[1,128], index: 4, kind: input, shape index: {}]   ;;  %s413_s5 = inlined_call_operand.hbm [shape: f32[16,128], index: 5, kind: output, shape index: {}]  }
   0x1   :  { %11 = vsyncpa [#allocation7], 0 }
   0x2   :  { %12 = vsyncpa [#allocation5], 0  ;;  %s30_s20 = sshll.u32 %s409_s1, 4  ;;  %s342_s21 = smov [#allocation6]   ;;  %s31_s20 = int_to_ptr.hbm [resolvable:$true] %s30_s20 }
   0x3   :  { %s32_s22 = sshll.u32 %s342_s21, 4  ;;  %s17_s25 = sshll.u32 %s408_s0, 4  ;;  %s33_s22 = int_to_ptr.vmem [resolvable:$true] %s32_s22  ;;  %s18_s25 = int_to_ptr.hbm [resolvable:$true] %s17_s25 }
   0x4   :  { %s343_s26 = smov 128   ;;  %s344_s27 = smov 8  }
   0x5   :  { %38 = dma.hbm_to_vmem [thread:$0]  %s31_s20, 2048, %s33_s22, [#allocation7], %s343_s26, %s343_s26, %s344_s27  }
   0x6   :  { %s345_s28 = smov [#allocation3]   ;;  %s45_s1 = sshll.u32 %s411_s3, 4  ;;  %s46_s1 = int_to_ptr.hbm [resolvable:$true] %s45_s1 }
   0x7   :  { %s19_s29 = sshll.u32 %s345_s28, 4  ;;  %s346_s0 = smov [#allocation8]   ;;  %s20_s29 = int_to_ptr.vmem [resolvable:$true] %s19_s29 }
   0x8   :  { %25 = dma.hbm_to_vmem [thread:$0]  %s18_s25, 256, %s20_s29, [#allocation4], %s343_s26, %s343_s26, %s344_s27  }
   0x9   :  { %s47_s7 = sshll.u32 %s346_s0, 4  ;;  %s48_s7 = int_to_ptr.vmem [resolvable:$true] %s47_s7 }
   0xa   :  { %53 = dma.hbm_to_vmem [thread:$0]  %s46_s1, 2048, %s48_s7, [#allocation7], %s343_s26, %s343_s26, %s344_s27  }
   0xb   :  { %336 = dma.done.wait [#allocation4], 256  }
   0xc   :  { %337 = vsyncadd [#allocation4], 4294967040 }
   0xd   :  { %338 = dma.done.wait [#allocation7], 4096  }
   0xe   :  { %339 = vsyncadd [#allocation7], 4294963200  ;;  %v85_v0 = vld [vmem:[#allocation6 + $0x78] sm:$0xff]  ;;  %v84_v1 = vld [vmem:[#allocation6 + $0x70] sm:$0xff]  ;;  %s347_s10 = smov [#allocation9]   ;;  %s182_s14 = sshll.u32 %s413_s5, 4  ;;  %s183_s14 = int_to_ptr.hbm [resolvable:$true] %s182_s14 }
   0xf   :  { %90 = vmatpush.msra.mxu0 %v85_v0  ;;  %196 = vmatpush.msra.mxu2 %v85_v0  ;;  %v83_v2 = vld [vmem:[#allocation6 + $0x68] sm:$0xff]  ;;  %v82_v3 = vld [vmem:[#allocation6 + $0x60] sm:$0xff]  ;;  %v81_v4 = vld [vmem:[#allocation6 + $0x58] sm:$0xff]  ;;  %s180_s11 = sshll.u32 %s347_s10, 4  ;;  %s181_s11 = int_to_ptr.vmem [resolvable:$true] %s180_s11 }
  0x10   :  { %v146_v5 = vld [vmem:[#allocation8 + $0x78] sm:$0xff]  ;;  %v145_v6 = vld [vmem:[#allocation8 + $0x70] sm:$0xff]  ;;  %v144_v8 = vld [vmem:[#allocation8 + $0x68] sm:$0xff] }
  0x11   :  { %91 = vmatpush.msra.mxu0 %v84_v1  ;;  %197 = vmatpush.msra.mxu2 %v84_v1  ;;  %v80_v7 = vld [vmem:[#allocation6 + $0x50] sm:$0xff]  ;;  %v79_v9 = vld [vmem:[#allocation6 + $0x48] sm:$0xff]  ;;  %v143_v10 = vld [vmem:[#allocation8 + $0x60] sm:$0xff] }
  0x12   :  { %151 = vmatpush.msra.mxu1 %v146_v5  ;;  %212 = vmatpush.msra.mxu3 %v146_v5  ;;  %v78_v11 = vld [vmem:[#allocation6 + $0x40] sm:$0xff]  ;;  %v142_v12 = vld [vmem:[#allocation8 + $0x58] sm:$0xff]  ;;  %v76_v14 = vld [vmem:[#allocation6 + $0x30] sm:$0xff] }
  0x13   :  { %92 = vmatpush.msra.mxu0 %v83_v2  ;;  %198 = vmatpush.msra.mxu2 %v83_v2  ;;  %v77_v13 = vld [vmem:[#allocation6 + $0x38] sm:$0xff]  ;;  %v75_v15 = vld [vmem:[#allocation6 + $0x28] sm:$0xff]  ;;  %v74_v16 = vld [vmem:[#allocation6 + $0x20] sm:$0xff] }
  0x14   :  { %152 = vmatpush.msra.mxu1 %v145_v6  ;;  %213 = vmatpush.msra.mxu3 %v145_v6  ;;  %v73_v17 = vld [vmem:[#allocation6 + $0x18] sm:$0xff]  ;;  %v72_v18 = vld [vmem:[#allocation6 + $0x10] sm:$0xff]  ;;  %v71_v19 = vld [vmem:[#allocation6 + $0x8] sm:$0xff] }
  0x15   :  { %93 = vmatpush.msra.mxu0 %v82_v3  ;;  %199 = vmatpush.msra.mxu2 %v82_v3  ;;  %v70_v20 = vld [vmem:[#allocation6] sm:$0xff]  ;;  %v68_v21 = vld [vmem:[#allocation3] sm:$0xff]  ;;  %v69_v22 = vld [vmem:[#allocation3 + $0x8] sm:$0xff] }
  0x16   :  { %153 = vmatpush.msra.mxu1 %v144_v8  ;;  %214 = vmatpush.msra.mxu3 %v144_v8  ;;  %v141_v23 = vld [vmem:[#allocation8 + $0x50] sm:$0xff]  ;;  %v140_v24 = vld [vmem:[#allocation8 + $0x48] sm:$0xff]  ;;  %v139_v25 = vld [vmem:[#allocation8 + $0x40] sm:$0xff] }
  0x17   :  { %94 = vmatpush.msra.mxu0 %v81_v4  ;;  %200 = vmatpush.msra.mxu2 %v81_v4  ;;  %v138_v26 = vld [vmem:[#allocation8 + $0x38] sm:$0xff]  ;;  %v137_v27 = vld [vmem:[#allocation8 + $0x30] sm:$0xff]  ;;  %v136_v28 = vld [vmem:[#allocation8 + $0x28] sm:$0xff] }
  0x18   :  { %154 = vmatpush.msra.mxu1 %v143_v10  ;;  %215 = vmatpush.msra.mxu3 %v143_v10  ;;  %v135_v29 = vld [vmem:[#allocation8 + $0x20] sm:$0xff]  ;;  %v134_v30 = vld [vmem:[#allocation8 + $0x18] sm:$0xff]  ;;  %v133_v31 = vld [vmem:[#allocation8 + $0x10] sm:$0xff] }
  0x19   :  { %95 = vmatpush.msra.mxu0 %v80_v7  ;;  %201 = vmatpush.msra.mxu2 %v80_v7  ;;  %v132_v32 = vld [vmem:[#allocation8 + $0x8] sm:$0xff]  ;;  %v131_v33 = vld [vmem:[#allocation8] sm:$0xff]  ;;  %v234_v34 = vld [vmem:[%s410_s2] ss:$0 sm:$0xff] }
  0x1a   :  { %155 = vmatpush.msra.mxu1 %v142_v12  ;;  %216 = vmatpush.msra.mxu3 %v142_v12  ;;  %v235_v57 = vld [vmem:[%s412_s4] ss:$0 sm:$0xff] }
  0x1b   :  { %96 = vmatpush.msra.mxu0 %v79_v9  ;;  %202 = vmatpush.msra.mxu2 %v79_v9 }
  0x1c   :  { %156 = vmatpush.msra.mxu1 %v141_v23  ;;  %217 = vmatpush.msra.mxu3 %v141_v23 }
  0x1d   :  { %97 = vmatpush.msra.mxu0 %v78_v11  ;;  %203 = vmatpush.msra.mxu2 %v78_v11 }
  0x1e   :  { %157 = vmatpush.msra.mxu1 %v140_v24  ;;  %218 = vmatpush.msra.mxu3 %v140_v24 }
  0x1f   :  { %98 = vmatpush.msra.mxu0 %v77_v13  ;;  %204 = vmatpush.msra.mxu2 %v77_v13 }
  0x20   :  { %158 = vmatpush.msra.mxu1 %v139_v25  ;;  %219 = vmatpush.msra.mxu3 %v139_v25 }
  0x21   :  { %99 = vmatpush.msra.mxu0 %v76_v14  ;;  %205 = vmatpush.msra.mxu2 %v76_v14 }
  0x22   :  { %159 = vmatpush.msra.mxu1 %v138_v26  ;;  %220 = vmatpush.msra.mxu3 %v138_v26 }
  0x23   :  { %100 = vmatpush.msra.mxu0 %v75_v15  ;;  %206 = vmatpush.msra.mxu2 %v75_v15 }
  0x24   :  { %160 = vmatpush.msra.mxu1 %v137_v27  ;;  %221 = vmatpush.msra.mxu3 %v137_v27 }
  0x25   :  { %101 = vmatpush.msra.mxu0 %v74_v16  ;;  %207 = vmatpush.msra.mxu2 %v74_v16 }
  0x26   :  { %161 = vmatpush.msra.mxu1 %v136_v28  ;;  %222 = vmatpush.msra.mxu3 %v136_v28 }
  0x27   :  { %102 = vmatpush.msra.mxu0 %v73_v17  ;;  %208 = vmatpush.msra.mxu2 %v73_v17 }
  0x28   :  { %162 = vmatpush.msra.mxu1 %v135_v29  ;;  %223 = vmatpush.msra.mxu3 %v135_v29 }
  0x29   :  { %103 = vmatpush.msra.mxu0 %v72_v18  ;;  %209 = vmatpush.msra.mxu2 %v72_v18 }
  0x2a   :  { %163 = vmatpush.msra.mxu1 %v134_v30  ;;  %224 = vmatpush.msra.mxu3 %v134_v30 }
  0x2b   :  { %104 = vmatpush.msra.mxu0 %v71_v19  ;;  %210 = vmatpush.msra.mxu2 %v71_v19 }
  0x2c   :  { %164 = vmatpush.msra.mxu1 %v133_v31  ;;  %225 = vmatpush.msra.mxu3 %v133_v31 }
  0x2d   :  { %105 = vmatpush.msra.mxu0 %v70_v20  ;;  %211 = vmatpush.msra.mxu2 %v70_v20 }
  0x2e   :  { %106 = vmatmul.f32.vlgmr.msra.gmra.mxu0 %v68_v21  ;;  %109 = vmatmul.f32.vlgmr.msra.gmra.mxu2 %v69_v22 }
  0x2f   :  { %165 = vmatpush.msra.mxu1 %v132_v32  ;;  %226 = vmatpush.msra.mxu3 %v132_v32 }
  0x31   :  { %166 = vmatpush.msra.mxu1 %v131_v33  ;;  %227 = vmatpush.msra.mxu3 %v131_v33 }
  0xab   :  { %v107_v35 = vpop.f32.mrf.mxu0 }
  0xac   :  { %v108_v36 = vadd.f32 %v234_v34, %v107_v35 }
  0xae   :  { %v117_v37 = vmul.f32 %v108_v36, %v108_v36  ;;  %v115_v38 = vmul.f32 0.7978846, %v108_v36  ;;  %v113_v50 = vmul.f32 0.5, %v108_v36 }
  0xb0   :  { %v119_v39 = vmul.f32 0.044715, %v117_v37 }
  0xb1   :  { %v110_v40 = vpop.f32.mrf.mxu2 }
  0xb2   :  { %v121_v41 = vadd.f32 1.0, %v119_v39  ;;  %v111_v42 = vadd.f32 %v234_v34, %v110_v40 }
  0xb4   :  { %v118_v43 = vmul.f32 %v111_v42, %v111_v42  ;;  %v123_v44 = vmul.f32 %v121_v41, %v115_v38  ;;  %v116_v46 = vmul.f32 0.7978846, %v111_v42  ;;  %v114_v54 = vmul.f32 0.5, %v111_v42 }
  0xb6   :  { %v120_v45 = vmul.f32 0.044715, %v118_v43  ;;  %236 = vtanh.f32 %v123_v44 }
  0xb8   :  { %v122_v47 = vadd.f32 1.0, %v120_v45 }
  0xba   :  { %v124_v48 = vmul.f32 %v122_v47, %v116_v46 }
  0xbc   :  { %v237_v49 = vpop.eup %236  ;;  %238 = vtanh.f32 %v124_v48 }
  0xbd   :  { %v127_v51 = vadd.f32 1.0, %v237_v49 }
  0xbf   :  { %v129_v52 = vmul.f32 %v127_v51, %v113_v50 }
  0xc1   :  { %167 = vmatmul.f32.vlgmr.msra.gmra.mxu1 %v129_v52 }
  0xc2   :  { %v239_v53 = vpop.eup %238 }
  0xc3   :  { %v128_v55 = vadd.f32 1.0, %v239_v53 }
  0xc5   :  { %v130_v56 = vmul.f32 %v128_v55, %v114_v54 }
  0xc7   :  { %170 = vmatmul.f32.vlgmr.msra.gmra.mxu3 %v130_v56 }
 0x13e   :  { %v168_v58 = vpop.f32.mrf.mxu1 }
 0x13f   :  { %v169_v59 = vadd.f32 %v235_v57, %v168_v58 }
 0x141   :  { %174 = vst [vmem:[#allocation9] sm:$0xff] %v169_v59 }
 0x14a   :  { %v171_v60 = vpop.f32.mrf.mxu3 }
 0x14b   :  { %v172_v61 = vadd.f32 %v235_v57, %v171_v60 }
 0x14d   :  { %175 = vst [vmem:[#allocation9 + $0x8] sm:$0xff] %v172_v61 }
 0x14e   :  { %188 = dma.vmem_to_hbm [thread:$0]  %s181_s11, 256, %s183_s14, [#allocation5], %s343_s26, %s343_s26, %s344_s27  }
 0x14f   :  { %340 = dma.done.wait [#allocation5], 256  }
 0x150   :  { %341 = vsyncadd [#allocation5], 4294967040 }
 0x151   :  { %193 = vsyncpa [#allocation4], 1 }
 0x152   :  { %194 = vsyncpa [#allocation7], 1 }
 0x153   :  { %195 = vsyncpa [#allocation5], 1 }

</bundles_post_ra>
